<compile_context>
chip_gen: v6e
topology: v6e:2x2x1
jax: 0.10.0
libtpu: 0.0.40
codegen_flags: <defaults>
</compile_context>

<pallas_src>
import functools
from typing import NamedTuple

import jax
import jax.numpy as jnp
from jax import lax
from jax.experimental import pallas as pl
from jax.experimental.pallas import tpu as pltpu


_EPS = 1e-12
_TM, _TN, _TK = 512, 512, 2048   # defaults per perf review (sweep 512-1024 on v6e)


def _round_up(x: int, m: int) -> int:
    return (x + m - 1) // m * m


# ----------------------------------------------------------------------------
# Kernel
# ----------------------------------------------------------------------------
def _sim_kernel(t_ref, v_ref, iv_ref, o_ref, *scratch, n_heads, n_k):
    """One (tm, tn) tile of  mean_h[ normalize(txt_h) @ normalize(vis_h).T ].

    t_ref : (tm, tk) bf16   text tile (head h, K-chunk k)
    v_ref : (tn, tk) bf16   video tile (head h, K-chunk k)
    iv_ref: (1, tn)  f32    per-row inverse L2 norm of vis (head h), lane-dense
    o_ref : (tm, tn)        output similarity tile
    scratch (static layout, only what this specialization needs):
        if n_k > 1     : acc (tm,tn) f32, sst (tm,1) f32
        if n_heads > 1 : sum (tm,tn) f32   (head-mean accumulator)
    """
    h = pl.program_id(2)
    k = pl.program_id(3)

    idx = 0
    if n_k > 1:
        acc_ref, sst_ref = scratch[0], scratch[1]
        idx = 2
    if n_heads > 1:
        sum_ref = scratch[idx]

    t = t_ref[...]
    v = v_ref[...]
    tf = t.astype(jnp.float32)

    # Contract last-vs-last: (tm, tk) x (tn, tk) -> (tm, tn); both operands stay
    # lane-dense on D, no materialized transpose.
    part = lax.dot_general(
        t, v, dimension_numbers=(((1,), (1,)), ((), ())),
        preferred_element_type=jnp.float32)
    # Fused text-side norm: sum of squares over the lane (D) axis, f32.
    ssq = jnp.sum(tf * tf, axis=-1, keepdims=True)            # (tm, 1)

    def _scaled(dots, ssq_t):
        inv_t = lax.rsqrt(ssq_t + _EPS)                        # (tm, 1)
        return (dots * inv_t) * iv_ref[...]                    # (tm, tn)

    def _emit(r):
        if n_heads == 1:
            o_ref[...] = r.astype(o_ref.dtype)
        else:
            sum_ref[...] = jnp.where(h == 0, r, sum_ref[...] + r)

    if n_k == 1:
        # Fast path: whole D in one tile -> no accumulator, no pl.when.
        _emit(_scaled(part, ssq))
    else:
        @pl.when(k == 0)
        def _():
            acc_ref[...] = jnp.zeros_like(acc_ref)
            sst_ref[...] = jnp.zeros_like(sst_ref)

        acc_ref[...] += part
        sst_ref[...] += ssq

        @pl.when(k == n_k - 1)
        def _():
            _emit(_scaled(acc_ref[...], sst_ref[...]))

    if n_heads > 1:
        last = (h == n_heads - 1)
        if n_k > 1:
            last = last & (k == n_k - 1)

        @pl.when(last)
        def _():
            o_ref[...] = (sum_ref[...] * (1.0 / n_heads)).astype(o_ref.dtype)


@functools.partial(jax.jit, static_argnames=("tm", "tn", "tk", "out_dtype"))
def _sim_padded(txt_bf, vis_bf, inv_v, *, tm, tn, tk, out_dtype):
    """txt_bf (H, Mp, Kp) bf16, vis_bf (H, Np, Kp) bf16, inv_v (H, 1, Np) f32."""
    H, Mp, Kp = txt_bf.shape
    _, Np, _ = vis_bf.shape
    n_k = Kp // tk
    grid = (Mp // tm, Np // tn, H, n_k)

    scratch = []
    if n_k > 1:
        scratch += [pltpu.VMEM((tm, tn), jnp.float32),
                    pltpu.VMEM((tm, 1), jnp.float32)]
    if H > 1:
        scratch += [pltpu.VMEM((tm, tn), jnp.float32)]

    kernel = functools.partial(_sim_kernel, n_heads=H, n_k=n_k)

    return pl.pallas_call(
        kernel,
        out_shape=jax.ShapeDtypeStruct((Mp, Np), out_dtype),
        grid_spec=pltpu.PrefetchScalarGridSpec(
            num_scalar_prefetch=0,
            grid=grid,
            in_specs=[
                pl.BlockSpec((None, tm, tk), lambda i, j, h, k: (h, i, k)),  # txt
                pl.BlockSpec((None, tn, tk), lambda i, j, h, k: (h, j, k)),  # vis
                pl.BlockSpec((None, 1, tn), lambda i, j, h, k: (h, 0, j)),   # 1/||vis||
            ],
            out_specs=pl.BlockSpec((tm, tn), lambda i, j, h, k: (i, j)),
            scratch_shapes=scratch,
        ),
        compiler_params=pltpu.CompilerParams(
            dimension_semantics=("parallel", "parallel", "arbitrary", "arbitrary"),
            vmem_limit_bytes=32 * 1024 * 1024,
        ),
    )(txt_bf, vis_bf, inv_v)


# ----------------------------------------------------------------------------
# Wrappers
# ----------------------------------------------------------------------------
class VisPrepped(NamedTuple):
    """Cached corpus-side preprocessing (reuse across text batches)."""
    vis_bf: jax.Array   # (H, Np, Kp) bf16, zero padded
    inv_v: jax.Array    # (H, 1, Np) f32, per-row inverse L2 norms
    n_vis: int
    d: int


def prep_vis(vis_embs, *, tn=_TN, tk=_TK) -> VisPrepped:
    """bf16 cast + pad + inverse row norms of the video corpus.

    Accepts (N, D) or head-major (H, N, D).  Cache the result across query
    batches (predict_multi) to avoid re-reading the corpus every call.
    """
    v = vis_embs if vis_embs.ndim == 3 else vis_embs[None]
    _, N, D = v.shape
    tn = min(tn, _round_up(N, 128))
    tk = min(tk, _round_up(D, 128))
    Np, Kp = _round_up(N, tn), _round_up(D, tk)
    v_bf = jnp.pad(v.astype(jnp.bfloat16), ((0, 0), (0, Np - N), (0, Kp - D)))
    vf = v_bf.astype(jnp.float32)                      # reduce from bf16 copy (half read bytes)
    inv_v = lax.rsqrt(jnp.sum(vf * vf, axis=-1) + _EPS)[:, None, :]   # (H, 1, Np)
    return VisPrepped(v_bf, inv_v, int(N), int(D))


def _cosine_sim_core(txt_h, vis_p: VisPrepped, tm, tn, tk, out_dtype):
    """txt_h: (H, M, D) raw embeddings; vis_p: prepped corpus."""
    H, M, D = txt_h.shape
    assert D == vis_p.d, "feature dims must match"
    Hv, Np, Kp = vis_p.vis_bf.shape
    assert Hv == H, "head counts of txt and vis must match"

    tm = min(tm, _round_up(M, 8))
    tn = min(tn, Np)
    tk = min(tk, Kp)
    assert Np % tn == 0 and Kp % tk == 0, (
        "prep_vis tile sizes must match cosine_sim tile sizes")

    Mp = _round_up(M, tm)
    txt_bf = jnp.pad(txt_h.astype(jnp.bfloat16), ((0, 0), (0, Mp - M), (0, Kp - D)))
    sim = _sim_padded(txt_bf, vis_p.vis_bf, vis_p.inv_v,
                      tm=tm, tn=tn, tk=tk, out_dtype=out_dtype)
    return sim[:M, :vis_p.n_vis]


def cosine_sim(txt_embs, vis, *, tm=_TM, tn=_TN, tk=_TK, out_dtype=jnp.float32):
    """Pallas equivalent of T2vmodel.compute_sim(txt, vis, measure='cosine').

    txt_embs: (M, D).  vis: (N, D) array OR a cached VisPrepped corpus.
    Returns (M, N) similarities in `out_dtype` (bf16 halves output traffic).
    """
    if not isinstance(vis, VisPrepped):
        vis = prep_vis(vis, tn=tn, tk=tk)
    return _cosine_sim_core(txt_embs[None], vis, tm, tn, tk, out_dtype)


def get_txt2vis_matrix(txt_embs, vis_embs, measure="cosine",
                       *, tm=_TM, tn=_TN, tk=_TK, out_dtype=jnp.float32):
    """Pallas equivalent of T2vmodel.get_txt2vis_matrix."""
    if measure != "cosine":
        # TODO(synk): 'hist' / 'euclidean' measures not implemented.
        raise NotImplementedError("only measure='cosine' is implemented")

    if txt_embs.ndim == 2 and (isinstance(vis_embs, VisPrepped) or vis_embs.ndim == 2):
        return cosine_sim(txt_embs, vis_embs, tm=tm, tn=tn, tk=tk, out_dtype=out_dtype)

    if txt_embs.ndim == 3 and vis_embs.ndim == 3:
        assert txt_embs.shape[1] == vis_embs.shape[1], "head count mismatch"
        # Fused multi-head: one pallas_call, per-head cosine sims averaged in VMEM.
        txt_h = jnp.transpose(txt_embs, (1, 0, 2))   # (H, M, D)
        vis_h = jnp.transpose(vis_embs, (1, 0, 2))   # (H, N, D)
        vis_p = prep_vis(vis_h, tn=tn, tk=tk)
        return _cosine_sim_core(txt_h, vis_p, tm, tn, tk, out_dtype)

    raise ValueError("vis_embs dims are not equal to txt_embs dims")


# ----------------------------------------------------------------------------
# Self-test
# ----------------------------------------------------------------------------
if __name__ == "__main__":
    key = jax.random.PRNGKey(0)
    k1, k2, k3, k4 = jax.random.split(key, 4)

    n_txt, n_vis, dim = 8, 20, 32
    txt = jax.random.normal(k1, (n_txt, dim), dtype=jnp.float32)
    vis = jax.random.normal(k2, (n_vis, dim), dtype=jnp.float32)

    # Pure-JAX reference of cosine_sim (= normalize rows, then A @ B.T).
    def ref_cosine(a, b):
        a = a / jnp.linalg.norm(a, axis=-1, keepdims=True)
        b = b / jnp.linalg.norm(b, axis=-1, keepdims=True)
        return a @ b.T

    sim = jax.block_until_ready(get_txt2vis_matrix(txt, vis))
    ref = ref_cosine(txt, vis)
    assert sim.shape == (n_txt, n_vis)
    assert bool(jnp.allclose(sim, ref, atol=2e-2, rtol=2e-2)), (
        "max abs err = %f" % float(jnp.max(jnp.abs(sim - ref))))

    # Cached-corpus path (predict_multi style): preprocess vis once, reuse.
    vis_cached = prep_vis(vis)
    sim_cached = jax.block_until_ready(cosine_sim(txt, vis_cached))
    assert bool(jnp.allclose(sim_cached, sim, atol=1e-6, rtol=1e-6))

    # Multi-head (3-D) branch of get_txt2vis_matrix, fused into one kernel.
    n_head = 2
    txt3 = jax.random.normal(k3, (n_txt, n_head, dim), dtype=jnp.float32)
    vis3 = jax.random.normal(k4, (n_vis, n_head, dim), dtype=jnp.float32)
    sim3 = jax.block_until_ready(get_txt2vis_matrix(txt3, vis3))
    ref3 = jnp.mean(
        jnp.stack([ref_cosine(txt3[:, h], vis3[:, h]) for h in range(n_head)]),
        axis=0)
    assert sim3.shape == (n_txt, n_vis)
    assert bool(jnp.allclose(sim3, ref3, atol=2e-2, rtol=2e-2)), (
        "max abs err = %f" % float(jnp.max(jnp.abs(sim3 - ref3))))

    print("KERNEL_OK")
</pallas_src>

<mosaic_0001>
module attributes {stable_mosaic.version = 11 : i64} {
  func.func @_sim_kernel(%arg0: i32, %arg1: i32, %arg2: i32, %arg3: i32, %arg4: memref<1x8x128xbf16, #tpu.memory_space<vmem>>, %arg5: memref<1x128x128xbf16, #tpu.memory_space<vmem>>, %arg6: memref<1x1x128xf32, #tpu.memory_space<vmem>>, %arg7: memref<8x128xf32, #tpu.memory_space<vmem>>) attributes {dimension_semantics = [#tpu.dimension_semantics<parallel>, #tpu.dimension_semantics<parallel>, #tpu.dimension_semantics<arbitrary>, #tpu.dimension_semantics<arbitrary>], iteration_bounds = array<i64: 1, 1, 1, 1>, scalar_prefetch = 0 : i64, scratch_operands = 0 : i64, tpu.core_type = #tpu.core_type<tc>, window_params = [{transform_indices = @transform_0, window_bounds = array<i64: 1, 8, 128>}, {transform_indices = @transform_1, window_bounds = array<i64: 1, 128, 128>}, {transform_indices = @transform_2, window_bounds = array<i64: 1, 1, 128>}, {transform_indices = @transform_3, window_bounds = array<i64: 8, 128>}]} {
    %c0 = arith.constant 0 : index
    %c0_0 = arith.constant 0 : index
    %c0_1 = arith.constant 0 : index
    %0 = vector.load %arg4[%c0, %c0_0, %c0_1] : memref<1x8x128xbf16, #tpu.memory_space<vmem>>, vector<1x8x128xbf16>
    %1 = vector.shape_cast %0 : vector<1x8x128xbf16> to vector<8x128xbf16>
    %c0_2 = arith.constant 0 : index
    %c0_3 = arith.constant 0 : index
    %c0_4 = arith.constant 0 : index
    %2 = vector.load %arg5[%c0_2, %c0_3, %c0_4] : memref<1x128x128xbf16, #tpu.memory_space<vmem>>, vector<1x128x128xbf16>
    %3 = vector.shape_cast %2 : vector<1x128x128xbf16> to vector<128x128xbf16>
    %4 = arith.extf %1 : vector<8x128xbf16> to vector<8x128xf32>
    %cst = arith.constant dense<0.000000e+00> : vector<8x128xf32>
    %5 = tpu.matmul %1, %3, %cst {dimension_numbers = #tpu.dot_dimension_numbers<[1], [1], [0], [0], [0, 0, 1, 0], [], []>} : vector<8x128xbf16>, vector<128x128xbf16>, vector<8x128xf32> -> vector<8x128xf32>
    %6 = arith.mulf %4, %4 : vector<8x128xf32>
    %cst_5 = arith.constant dense<0.000000e+00> : vector<8xf32>
    %7 = vector.multi_reduction <add>, %6, %cst_5 [1] : vector<8x128xf32> to vector<8xf32>
    %8 = vector.shape_cast %7 : vector<8xf32> to vector<8x1xf32>
    %cst_6 = arith.constant 9.99999996E-13 : f32
    %9 = vector.broadcast %cst_6 : f32 to vector<8x1xf32>
    %10 = arith.addf %8, %9 : vector<8x1xf32>
    %11 = math.rsqrt %10 : vector<8x1xf32>
    %12 = vector.broadcast %11 : vector<8x1xf32> to vector<8x128xf32>
    %13 = arith.mulf %5, %12 : vector<8x128xf32>
    %c0_7 = arith.constant 0 : index
    %c0_8 = arith.constant 0 : index
    %c0_9 = arith.constant 0 : index
    %14 = vector.load %arg6[%c0_7, %c0_8, %c0_9] : memref<1x1x128xf32, #tpu.memory_space<vmem>>, vector<1x1x128xf32>
    %15 = vector.shape_cast %14 : vector<1x1x128xf32> to vector<1x128xf32>
    %16 = vector.broadcast %15 : vector<1x128xf32> to vector<8x128xf32>
    %17 = arith.mulf %13, %16 : vector<8x128xf32>
    %c0_10 = arith.constant 0 : index
    %c0_11 = arith.constant 0 : index
    %18 = vector.load %arg7[%c0_10, %c0_11] : memref<8x128xf32, #tpu.memory_space<vmem>>, vector<8x128xf32>
    tpu.vector_store %arg7[%c0_10, %c0_11], %17 {strides = array<i32>} : memref<8x128xf32, #tpu.memory_space<vmem>>, vector<8x128xf32>,
    return
  }
  func.func @transform_0(%arg0: i32, %arg1: i32, %arg2: i32, %arg3: i32) -> (i32, i32, i32) {
    %c0_i32 = arith.constant 0 : i32
    return %arg2, %arg0, %arg3 : i32, i32, i32
  }
  func.func @transform_1(%arg0: i32, %arg1: i32, %arg2: i32, %arg3: i32) -> (i32, i32, i32) {
    %c0_i32 = arith.constant 0 : i32
    return %arg2, %arg1, %arg3 : i32, i32, i32
  }
  func.func @transform_2(%arg0: i32, %arg1: i32, %arg2: i32, %arg3: i32) -> (i32, i32, i32) {
    %c0_i32 = arith.constant 0 : i32
    %c0_i32_0 = arith.constant 0 : i32
    return %arg2, %c0_i32, %arg1 : i32, i32, i32
  }
  func.func @transform_3(%arg0: i32, %arg1: i32, %arg2: i32, %arg3: i32) -> (i32, i32) {
    %c0_i32 = arith.constant 0 : i32
    return %arg0, %arg1 : i32, i32
  }
}

</mosaic_0001>

<bundles_post_ra>
// kernel: _sim_padded.1
= control target key start
LH: loop header
LB: loop body
LE: loop exit
PB: predicated region body
PF: predicated region fallthrough
CT: control target
= control target key end

     0   :  { %8 = vsyncpa [#allocation3], 0  ;;  %s339_s0 = inlined_call_operand.hbm [shape: bf16[1,8,128], index: 0, kind: input, shape index: {}]   ;;  %s340_s1 = inlined_call_operand.hbm [shape: bf16[1,128,128], index: 1, kind: input, shape index: {}]   ;;  %s341_s2 = inlined_call_operand.vmem [shape: f32[1,1,128], index: 2, kind: input, shape index: {}]   ;;  %s342_s3 = inlined_call_operand.hbm [shape: f32[8,128], index: 3, kind: output, shape index: {}]  }
   0x1   :  { %9 = vsyncpa [#allocation6], 0 }
   0x2   :  { %10 = vsyncpa [#allocation4], 0  ;;  %s300_s12 = smov [#allocation2]   ;;  %s301_s14 = smov [#allocation5]  }
   0x3   :  { %s17_s13 = sshll.u32 %s300_s12, 4  ;;  %s26_s15 = sshll.u32 %s301_s14, 4  ;;  %s18_s13 = int_to_ptr.vmem [resolvable:$true] %s17_s13  ;;  %s27_s15 = int_to_ptr.vmem [resolvable:$true] %s26_s15 }
   0x4   :  { %s242_s16 = scalar_lea.vmem %s18_s13, 64  ;;  %p247_p1 = scmp.lt.s32.totalorder %s18_s13, %s18_s13 }
   0x5   :  { %p243_p0 = scmp.ne.s32.totalorder %s18_s13, %s242_s16  ;;  %p248_p2 = scmp.lt.s32.totalorder %s242_s16, %s242_s16 }
   0x7   :  { %p249_p3 = por %p248_p2, %p247_p1 }
   0x9   :  { %p250_p4 = pnand %p249_p3, %p243_p0 }
   0xb   :  { %253 = shalt.err (!%p250_p4)
}
   0xc   :  { %20 = dma.hbm_to_vmem [thread:$0]  %s339_s0, 64, %s18_s13, [#allocation3]  }
   0xd   :  { %s262_s19 = scalar_lea.vmem %s27_s15, 1024  ;;  %p267_p6 = scmp.lt.s32.totalorder %s27_s15, %s27_s15 }
   0xe   :  { %p263_p5 = scmp.ne.s32.totalorder %s27_s15, %s262_s19  ;;  %p268_p7 = scmp.lt.s32.totalorder %s262_s19, %s262_s19 }
  0x10   :  { %p269_p8 = por %p268_p7, %p267_p6 }
  0x12   :  { %p270_p9 = pnand %p269_p8, %p263_p5 }
  0x14   :  { %273 = shalt.err (!%p270_p9)
}
  0x15   :  { %s302_s20 = smov 64   ;;  %s303_s21 = smov 4  }
  0x16   :  { %32 = dma.hbm_to_vmem [thread:$0]  %s340_s1, 1024, %s27_s15, [#allocation6], %s302_s20, %s302_s20, %s303_s21  }
  0x17   :  { %294 = dma.done.wait [#allocation3], 64  }
  0x18   :  { %295 = vsyncadd [#allocation3], 4294967232 }
  0x19   :  { %296 = dma.done.wait [#allocation6], 1024  }
  0x1a   :  { %297 = vsyncadd [#allocation6], 4294966272  ;;  %v304_v0 = vmov 0.0   ;;  %vm305_vm0 = vmmov 0   ;;  %v224_v1 = vld [vmem:[#allocation5 + $0x38] sm:$0xff]   ;;  %v225_v2 = vld [vmem:[#allocation5 + $0x30] sm:$0xff]  }
  0x1b   :  { %197 = vmatprep.subr.bf16.mxu0 %v304_v0  ;;  %213 = vmatprep.mubr.msk.bf16.mxu0 %vm305_vm0, %v304_v0  ;;  %v42_v3 = vld [vmem:[#allocation2] sm:$0xf]  ;;  %v226_v6 = vld [vmem:[#allocation5 + $0x28] sm:$0xff]   ;;  %v227_v7 = vld [vmem:[#allocation5 + $0x20] sm:$0xff]   ;;  %s306_s24 = smov [#allocation7]  }
  0x1c   :  { %198 = vmatpush3.bf16.xpose.msra.mxu0 %v224_v1  ;;  %v59_v4 = vunpack.c.l.bf16 %v42_v3  ;;  %v228_v8 = vld [vmem:[#allocation5 + $0x18] sm:$0xff]   ;;  %v229_v9 = vld [vmem:[#allocation5 + $0x10] sm:$0xff]   ;;  %v230_v10 = vld [vmem:[#allocation5 + $0x8] sm:$0xff]   ;;  %s169_s25 = sshll.u32 %s306_s24, 4  ;;  %s170_s25 = int_to_ptr.vmem [resolvable:$true] %s169_s25 }
  0x1d   :  { %199 = vmatprep.subr.bf16.mxu0 %v304_v0  ;;  %v231_v11 = vld [vmem:[#allocation5] sm:$0xff]   ;;  %v187_v16 = vld [vmem:[%s341_s2] ss:$0 sm:$0xff]  ;;  %s274_s26 = scalar_lea.vmem %s170_s25, 128  ;;  %p279_p11 = scmp.lt.s32.totalorder %s170_s25, %s170_s25 }
  0x1e   :  { %v148_v5 = vmul.f32 %v59_v4, %v59_v4  ;;  %p275_p10 = scmp.ne.s32.totalorder %s170_s25, %s274_s26  ;;  %p280_p12 = scmp.lt.s32.totalorder %s274_s26, %s274_s26 }
  0x20   :  { %149 = vadd.xlane.f32.xlu0 %v148_v5  ;;  %p281_p13 = por %p280_p12, %p279_p11 }
  0x22   :  { %p282_p0 = pnand %p281_p13, %p275_p10 }
  0x24   :  { %200 = vmatpush3.bf16.xpose.msra.mxu0 %v225_v2 }
  0x25   :  { %201 = vmatprep.subr.bf16.mxu0 %v304_v0 }
  0x2c   :  { %202 = vmatpush3.bf16.xpose.msra.mxu0 %v226_v6 }
  0x2d   :  { %203 = vmatprep.subr.bf16.mxu0 %v304_v0 }
  0x34   :  { %204 = vmatpush3.bf16.xpose.msra.mxu0 %v227_v7 }
  0x35   :  { %205 = vmatprep.subr.bf16.mxu0 %v304_v0 }
  0x3c   :  { %206 = vmatpush3.bf16.xpose.msra.mxu0 %v228_v8 }
  0x3d   :  { %207 = vmatprep.subr.bf16.mxu0 %v304_v0 }
  0x44   :  { %208 = vmatpush3.bf16.xpose.msra.mxu0 %v229_v9 }
  0x45   :  { %209 = vmatprep.subr.bf16.mxu0 %v304_v0 }
  0x4c   :  { %210 = vmatpush3.bf16.xpose.msra.mxu0 %v230_v10 }
  0x4d   :  { %211 = vmatprep.subr.bf16.mxu0 %v304_v0 }
  0x54   :  { %212 = vmatpush3.bf16.xpose.msra.mxu0 %v231_v11 }
  0x5b   :  { %214 = vmatmul.mubr.bf16.vlgmr.msra.gmra.mxu0 %v42_v3 }
  0xa9   :  { %v150_v12 = vpop.xlane.xlu0 %149 }
  0xaa   :  { %v151_v13 = vadd.f32 1e-12, %v150_v12 }
  0xac   :  { %232 = vrsqrt.f32 %v151_v13 }
  0xb9   :  { %v233_v14 = vpop.eup %232 }
 0x11b   :  { %v142_v15 = vpop.f32.mrf.mxu0 }
 0x11c   :  { %v153_v17 = vmul.f32 %v233_v14, %v142_v15 }
 0x11d   :  { %v215_v18 = vpop.f32.mrf.mxu0 }
 0x11e   :  { %v161_v19 = vmul.f32 %v187_v16, %v153_v17 }
 0x11f   :  { %v145_v20 = vpop.f32.mrf.mxu0 }
 0x120   :  { %162 = vst [vmem:[#allocation7] sm:$0xff] %v161_v19 }
 0x121   :  { %v216_v21 = vpop.f32.mrf.mxu0 }
 0x122   :  { %285 = shalt.err (!%p282_p0)
}
 0x123   :  { %172 = dma.vmem_to_hbm [thread:$0]  %s170_s25, 128, %s342_s3, [#allocation4]  }
 0x124   :  { %298 = dma.done.wait [#allocation4], 128  }
 0x125   :  { %299 = vsyncadd [#allocation4], 4294967168 }
 0x126   :  { %176 = vsyncpa [#allocation3], 1 }
 0x127   :  { %177 = vsyncpa [#allocation6], 1 }
 0x128   :  { %178 = vsyncpa [#allocation4], 1 }

</bundles_post_ra>
